<compile_context>
chip_gen: v7x
topology: tpu7x:2x2x1
jax: 0.10.0
libtpu: 0.0.40
codegen_flags: <defaults>
</compile_context>

<pallas_src>
import jax
import jax.numpy as jnp
from jax.experimental import pallas as pl
from jax.experimental.pallas import tpu as pltpu

IN_FEATURES = 50 * 4 * 4     # 800
HIDDEN = 100
NUM_CLASSES = 10
NUM_CLASSES_PAD = 128        # lane-dense output block


def classifier_kernel(x_ref,
                      w1_ref, b1_ref,
                      w2_ref, b2_ref,
                      w3_ref, b3_ref,
                      out_ref):
    # ---- fc1 (+ folded bn1) + relu --------------------------------------
    x = x_ref[...].astype(jnp.bfloat16)                     # bf16 into the MXU
    h1 = jnp.dot(x, w1_ref[...], preferred_element_type=jnp.float32)
    h1 = h1 + b1_ref[...]                                   # bias+BN shift (f32)
    h1 = jnp.maximum(h1, 0.0)                               # ReLU
    # Dropout2d: identity in eval mode.

    # ---- fc2 (+ folded bn2) + relu --------------------------------------
    h2 = jnp.dot(h1.astype(jnp.bfloat16), w2_ref[...],
                 preferred_element_type=jnp.float32)
    h2 = h2 + b2_ref[...]
    h2 = jnp.maximum(h2, 0.0)

    # ---- fc3 + log_softmax (dim=1) ---------------------------------------
    # Padded classes 10..127 have zero weights and bias = -1e30, so they carry
    # zero probability mass and do not change the 10-class log_softmax.
    logits = jnp.dot(h2.astype(jnp.bfloat16), w3_ref[...],
                     preferred_element_type=jnp.float32)
    logits = logits + b3_ref[...]
    m = jnp.max(logits, axis=-1, keepdims=True)
    shifted = logits - m
    lse = jnp.log(jnp.sum(jnp.exp(shifted), axis=-1, keepdims=True))
    out_ref[...] = (shifted - lse).astype(out_ref.dtype)    # full-lane store


def prepare_params(params, eps=1e-5):
    """One-time prep: transpose to [in, out], fold BN (eval) into W/b, cast,
    and pad the class dim to 128 for lane-dense stores.

    BatchNorm1d eval:  y = (z - mean) / sqrt(var + eps) * gamma + beta
                         = z * s + t,  s = gamma / sqrt(var + eps),
                                       t = beta - mean * s
    Folded into the preceding linear: W' = W.T * s (per output column),
                                      b' = b * s + t.
    """
    (w1, b1, g1, be1, m1, v1,
     w2, b2, g2, be2, m2, v2,
     w3, b3) = params

    s1 = g1 / jnp.sqrt(v1 + eps)
    t1 = be1 - m1 * s1
    s2 = g2 / jnp.sqrt(v2 + eps)
    t2 = be2 - m2 * s2

    w1f = (w1.T * s1[None, :]).astype(jnp.bfloat16)          # [800, 100]
    b1f = (b1 * s1 + t1)[None, :].astype(jnp.float32)        # [1, 100]
    w2f = (w2.T * s2[None, :]).astype(jnp.bfloat16)          # [100, 100]
    b2f = (b2 * s2 + t2)[None, :].astype(jnp.float32)        # [1, 100]

    # fc3 padded to 128 output columns: zero weights, very-negative bias so
    # padded classes contribute exp(~-1e30) == 0 to the softmax denominator.
    w3f = jnp.zeros((HIDDEN, NUM_CLASSES_PAD), jnp.bfloat16)
    w3f = w3f.at[:, :NUM_CLASSES].set(w3.T.astype(jnp.bfloat16))
    b3f = jnp.full((1, NUM_CLASSES_PAD), -1e30, jnp.float32)
    b3f = b3f.at[0, :NUM_CLASSES].set(b3.astype(jnp.float32))

    # Materialize once so no transpose/rsqrt/pad runs per forward call.
    return jax.tree_util.tree_map(jnp.asarray,
                                  (w1f, b1f, w2f, b2f, w3f, b3f))


def _round_up(n, m):
    return ((n + m - 1) // m) * m


def classifier_forward(x, prepared, *, tb=2048):
    """x: [B, 800] float32 (or bfloat16) -> [B, 10] log-probabilities (f32)."""
    w1f, b1f, w2f, b2f, w3f, b3f = prepared
    B = x.shape[0]

    # --- batch tile selection ---------------------------------------------
    # Cap TB so the double-buffered x block stays under ~24 MB (safe under
    # v7x's 32 MiB scoped-VMEM default; f32 x -> TB <= 3840, bf16 -> 7680).
    bytes_per_row = IN_FEATURES * x.dtype.itemsize
    max_tb = max(8, ((24 * 1024 * 1024) // (2 * bytes_per_row)) // 8 * 8)
    TB = min(tb, max_tb, _round_up(B, 8))
    # Prefer >= 2 grid steps so the "parallel" batch axis can split across
    # v7x's two TensorCores (only when B is big enough for 8-aligned halves).
    if pl.cdiv(B, TB) == 1 and B >= 16:
        TB = _round_up(pl.cdiv(B, 2), 8)

    grid = (pl.cdiv(B, TB),)   # ragged last block: OOB output rows are masked

    # Weights / biases: full-array blocks, same block index every grid step ->
    # VMEM-resident across the whole batch sweep.
    resident = lambda shape: pl.BlockSpec(shape, lambda i: (0, 0))

    # Advisory cost estimate: memory-bound, cheap -> lets XLA overlap this call
    # with surrounding ops (feature extractor / domain head).
    weight_bytes = ((IN_FEATURES * HIDDEN + HIDDEN * HIDDEN
                     + HIDDEN * NUM_CLASSES_PAD) * 2
                    + (HIDDEN + HIDDEN + NUM_CLASSES_PAD) * 4)
    cost = pl.CostEstimate(
        flops=2 * B * (IN_FEATURES * HIDDEN + HIDDEN * HIDDEN
                       + HIDDEN * NUM_CLASSES_PAD),
        transcendentals=B * (NUM_CLASSES_PAD + 1),
        bytes_accessed=B * bytes_per_row + B * NUM_CLASSES_PAD * 4 + weight_bytes,
    )

    out = pl.pallas_call(
        classifier_kernel,
        out_shape=jax.ShapeDtypeStruct((B, NUM_CLASSES_PAD), jnp.float32),
        grid=grid,
        in_specs=[
            pl.BlockSpec((TB, IN_FEATURES), lambda i: (i, 0)),   # x (streamed)
            resident((IN_FEATURES, HIDDEN)),                     # w1'
            resident((1, HIDDEN)),                               # b1'
            resident((HIDDEN, HIDDEN)),                          # w2'
            resident((1, HIDDEN)),                               # b2'
            resident((HIDDEN, NUM_CLASSES_PAD)),                 # w3 (padded)
            resident((1, NUM_CLASSES_PAD)),                      # b3 (padded)
        ],
        out_specs=pl.BlockSpec((TB, NUM_CLASSES_PAD), lambda i: (i, 0)),
        compiler_params=pltpu.CompilerParams(
            dimension_semantics=("parallel",),        # megacore batch split
            vmem_limit_bytes=48 * 1024 * 1024,        # v5e default is 16 MiB
        ),
        cost_estimate=cost,
    )(x, w1f, b1f, w2f, b2f, w3f, b3f)

    return out[:, :NUM_CLASSES]


def init_params(key):
    """Deterministic parameter init matching the PyTorch module's shapes."""
    ks = jax.random.split(key, 6)

    def linear(kw, kb, fan_in, fan_out):
        bound = 1.0 / jnp.sqrt(fan_in)
        w = jax.random.uniform(kw, (fan_out, fan_in), jnp.float32, -bound, bound)
        b = jax.random.uniform(kb, (fan_out,), jnp.float32, -bound, bound)
        return w, b

    w1, b1 = linear(ks[0], ks[1], IN_FEATURES, HIDDEN)
    w2, b2 = linear(ks[2], ks[3], HIDDEN, HIDDEN)
    w3, b3 = linear(ks[4], ks[5], HIDDEN, NUM_CLASSES)

    # BatchNorm1d defaults: gamma=1, beta=0, running_mean=0, running_var=1
    g1 = jnp.ones((HIDDEN,), jnp.float32)
    be1 = jnp.zeros((HIDDEN,), jnp.float32)
    m1 = jnp.zeros((HIDDEN,), jnp.float32)
    v1 = jnp.ones((HIDDEN,), jnp.float32)
    g2 = jnp.ones((HIDDEN,), jnp.float32)
    be2 = jnp.zeros((HIDDEN,), jnp.float32)
    m2 = jnp.zeros((HIDDEN,), jnp.float32)
    v2 = jnp.ones((HIDDEN,), jnp.float32)

    return (w1, b1, g1, be1, m1, v1,
            w2, b2, g2, be2, m2, v2,
            w3, b3)


def reference_forward(x, params, eps=1e-5):
    """Plain-JAX reference (f32 end-to-end) for a sanity check."""
    (w1, b1, g1, be1, m1, v1,
     w2, b2, g2, be2, m2, v2,
     w3, b3) = params
    h = x @ w1.T + b1
    h = (h - m1) / jnp.sqrt(v1 + eps) * g1 + be1
    h = jnp.maximum(h, 0.0)
    h = h @ w2.T + b2
    h = (h - m2) / jnp.sqrt(v2 + eps) * g2 + be2
    h = jnp.maximum(h, 0.0)
    logits = h @ w3.T + b3
    return jax.nn.log_softmax(logits, axis=-1)


if __name__ == "__main__":
    key = jax.random.PRNGKey(0)
    k_x, k_p = jax.random.split(key)

    B = 8
    x = jax.random.normal(k_x, (B, IN_FEATURES), jnp.float32)
    params = init_params(k_p)

    # One-time parameter preparation (model-load time).
    prepared = prepare_params(params)

    out = classifier_forward(x, prepared)
    out = jax.block_until_ready(out)

    # Sanity: log-probabilities of shape [B, 10], rows sum (in prob space) to 1,
    # and close to the f32 reference (bf16 matmul inputs, f32 accumulation).
    assert out.shape == (B, NUM_CLASSES), out.shape
    row_prob_sums = jnp.exp(out).sum(axis=-1)
    assert jnp.allclose(row_prob_sums, 1.0, atol=1e-4), row_prob_sums
    ref = reference_forward(x, params)
    assert jnp.allclose(out, ref, atol=5e-2), jnp.max(jnp.abs(out - ref))

    print("KERNEL_OK")
</pallas_src>

<mosaic_0001>
module attributes {stable_mosaic.version = 11 : i64} {
  func.func @classifier_kernel(%arg0: i32, %arg1: memref<8x800xf32, #tpu.memory_space<vmem>>, %arg2: memref<800x100xbf16, #tpu.memory_space<vmem>>, %arg3: memref<1x100xf32, #tpu.memory_space<vmem>>, %arg4: memref<100x100xbf16, #tpu.memory_space<vmem>>, %arg5: memref<1x100xf32, #tpu.memory_space<vmem>>, %arg6: memref<100x128xbf16, #tpu.memory_space<vmem>>, %arg7: memref<1x128xf32, #tpu.memory_space<vmem>>, %arg8: memref<8x128xf32, #tpu.memory_space<vmem>>) attributes {dimension_semantics = [#tpu.dimension_semantics<parallel>], iteration_bounds = array<i64: 1>, scalar_prefetch = 0 : i64, scratch_operands = 0 : i64, tpu.core_type = #tpu.core_type<tc>, window_params = [{transform_indices = @transform_0, window_bounds = array<i64: 8, 800>}, {pipeline_mode = #tpu.pipeline_mode<synchronous>, transform_indices = @transform_1, window_bounds = array<i64: 800, 100>}, {pipeline_mode = #tpu.pipeline_mode<synchronous>, transform_indices = @transform_2, window_bounds = array<i64: 1, 100>}, {pipeline_mode = #tpu.pipeline_mode<synchronous>, transform_indices = @transform_3, window_bounds = array<i64: 100, 100>}, {pipeline_mode = #tpu.pipeline_mode<synchronous>, transform_indices = @transform_4, window_bounds = array<i64: 1, 100>}, {pipeline_mode = #tpu.pipeline_mode<synchronous>, transform_indices = @transform_5, window_bounds = array<i64: 100, 128>}, {pipeline_mode = #tpu.pipeline_mode<synchronous>, transform_indices = @transform_6, window_bounds = array<i64: 1, 128>}, {transform_indices = @transform_7, window_bounds = array<i64: 8, 128>}]} {
    %c0 = arith.constant 0 : index
    %c0_0 = arith.constant 0 : index
    %0 = vector.load %arg1[%c0, %c0_0] : memref<8x800xf32, #tpu.memory_space<vmem>>, vector<8x800xf32>
    %1 = arith.truncf %0 : vector<8x800xf32> to vector<8x800xbf16>
    %c0_1 = arith.constant 0 : index
    %c0_2 = arith.constant 0 : index
    %2 = vector.load %arg2[%c0_1, %c0_2] : memref<800x100xbf16, #tpu.memory_space<vmem>>, vector<800x100xbf16>
    %cst = arith.constant dense<0.000000e+00> : vector<8x100xf32>
    %3 = tpu.matmul %1, %2, %cst {dimension_numbers = #tpu.dot_dimension_numbers<[1], [0], [0], [1], [0, 0, 1, 1], [], []>} : vector<8x800xbf16>, vector<800x100xbf16>, vector<8x100xf32> -> vector<8x100xf32>
    %c0_3 = arith.constant 0 : index
    %c0_4 = arith.constant 0 : index
    %4 = vector.load %arg3[%c0_3, %c0_4] : memref<1x100xf32, #tpu.memory_space<vmem>>, vector<1x100xf32>
    %5 = vector.broadcast %4 : vector<1x100xf32> to vector<8x100xf32>
    %6 = arith.addf %3, %5 : vector<8x100xf32>
    %cst_5 = arith.constant 0.000000e+00 : f32
    %7 = vector.broadcast %cst_5 : f32 to vector<8x100xf32>
    %8 = arith.maximumf %6, %7 : vector<8x100xf32>
    %9 = arith.truncf %8 : vector<8x100xf32> to vector<8x100xbf16>
    %c0_6 = arith.constant 0 : index
    %c0_7 = arith.constant 0 : index
    %10 = vector.load %arg4[%c0_6, %c0_7] : memref<100x100xbf16, #tpu.memory_space<vmem>>, vector<100x100xbf16>
    %cst_8 = arith.constant dense<0.000000e+00> : vector<8x100xf32>
    %11 = tpu.matmul %9, %10, %cst_8 {dimension_numbers = #tpu.dot_dimension_numbers<[1], [0], [0], [1], [0, 0, 1, 1], [], []>} : vector<8x100xbf16>, vector<100x100xbf16>, vector<8x100xf32> -> vector<8x100xf32>
    %c0_9 = arith.constant 0 : index
    %c0_10 = arith.constant 0 : index
    %12 = vector.load %arg5[%c0_9, %c0_10] : memref<1x100xf32, #tpu.memory_space<vmem>>, vector<1x100xf32>
    %13 = vector.broadcast %12 : vector<1x100xf32> to vector<8x100xf32>
    %14 = arith.addf %11, %13 : vector<8x100xf32>
    %cst_11 = arith.constant 0.000000e+00 : f32
    %15 = vector.broadcast %cst_11 : f32 to vector<8x100xf32>
    %16 = arith.maximumf %14, %15 : vector<8x100xf32>
    %17 = arith.truncf %16 : vector<8x100xf32> to vector<8x100xbf16>
    %c0_12 = arith.constant 0 : index
    %c0_13 = arith.constant 0 : index
    %18 = vector.load %arg6[%c0_12, %c0_13] : memref<100x128xbf16, #tpu.memory_space<vmem>>, vector<100x128xbf16>
    %cst_14 = arith.constant dense<0.000000e+00> : vector<8x128xf32>
    %19 = tpu.matmul %17, %18, %cst_14 {dimension_numbers = #tpu.dot_dimension_numbers<[1], [0], [0], [1], [0, 0, 1, 1], [], []>} : vector<8x100xbf16>, vector<100x128xbf16>, vector<8x128xf32> -> vector<8x128xf32>
    %c0_15 = arith.constant 0 : index
    %c0_16 = arith.constant 0 : index
    %20 = vector.load %arg7[%c0_15, %c0_16] : memref<1x128xf32, #tpu.memory_space<vmem>>, vector<1x128xf32>
    %21 = vector.broadcast %20 : vector<1x128xf32> to vector<8x128xf32>
    %22 = arith.addf %19, %21 : vector<8x128xf32>
    %cst_17 = arith.constant dense<0xFF800000> : vector<8xf32>
    %23 = vector.multi_reduction <maximumf>, %22, %cst_17 [1] : vector<8x128xf32> to vector<8xf32>
    %24 = vector.shape_cast %23 : vector<8xf32> to vector<8x1xf32>
    %25 = vector.broadcast %24 : vector<8x1xf32> to vector<8x128xf32>
    %26 = arith.subf %22, %25 : vector<8x128xf32>
    %27 = math.exp %26 : vector<8x128xf32>
    %cst_18 = arith.constant dense<0.000000e+00> : vector<8xf32>
    %28 = vector.multi_reduction <add>, %27, %cst_18 [1] : vector<8x128xf32> to vector<8xf32>
    %29 = vector.shape_cast %28 : vector<8xf32> to vector<8x1xf32>
    %30 = math.log %29 : vector<8x1xf32>
    %31 = vector.broadcast %30 : vector<8x1xf32> to vector<8x128xf32>
    %32 = arith.subf %26, %31 : vector<8x128xf32>
    %c0_19 = arith.constant 0 : index
    %c0_20 = arith.constant 0 : index
    %33 = vector.load %arg8[%c0_19, %c0_20] : memref<8x128xf32, #tpu.memory_space<vmem>>, vector<8x128xf32>
    tpu.vector_store %arg8[%c0_19, %c0_20], %32 {strides = array<i32>} : memref<8x128xf32, #tpu.memory_space<vmem>>, vector<8x128xf32>,
    return
  }
  func.func @transform_0(%arg0: i32) -> (i32, i32) {
    %c0_i32 = arith.constant 0 : i32
    %c0_i32_0 = arith.constant 0 : i32
    return %arg0, %c0_i32 : i32, i32
  }
  func.func @transform_1(%arg0: i32) -> (i32, i32) {
    %c0_i32 = arith.constant 0 : i32
    %c0_i32_0 = arith.constant 0 : i32
    %c0_i32_1 = arith.constant 0 : i32
    return %c0_i32, %c0_i32_0 : i32, i32
  }
  func.func @transform_2(%arg0: i32) -> (i32, i32) {
    %c0_i32 = arith.constant 0 : i32
    %c0_i32_0 = arith.constant 0 : i32
    %c0_i32_1 = arith.constant 0 : i32
    return %c0_i32, %c0_i32_0 : i32, i32
  }
  func.func @transform_3(%arg0: i32) -> (i32, i32) {
    %c0_i32 = arith.constant 0 : i32
    %c0_i32_0 = arith.constant 0 : i32
    %c0_i32_1 = arith.constant 0 : i32
    return %c0_i32, %c0_i32_0 : i32, i32
  }
  func.func @transform_4(%arg0: i32) -> (i32, i32) {
    %c0_i32 = arith.constant 0 : i32
    %c0_i32_0 = arith.constant 0 : i32
    %c0_i32_1 = arith.constant 0 : i32
    return %c0_i32, %c0_i32_0 : i32, i32
  }
  func.func @transform_5(%arg0: i32) -> (i32, i32) {
    %c0_i32 = arith.constant 0 : i32
    %c0_i32_0 = arith.constant 0 : i32
    %c0_i32_1 = arith.constant 0 : i32
    return %c0_i32, %c0_i32_0 : i32, i32
  }
  func.func @transform_6(%arg0: i32) -> (i32, i32) {
    %c0_i32 = arith.constant 0 : i32
    %c0_i32_0 = arith.constant 0 : i32
    %c0_i32_1 = arith.constant 0 : i32
    return %c0_i32, %c0_i32_0 : i32, i32
  }
  func.func @transform_7(%arg0: i32) -> (i32, i32) {
    %c0_i32 = arith.constant 0 : i32
    %c0_i32_0 = arith.constant 0 : i32
    return %arg0, %c0_i32 : i32, i32
  }
}

</mosaic_0001>

<bundles_post_ra>
// kernel: tpu_custom_call.1
= control target key start
LH: loop header
LB: loop body
LE: loop exit
PB: predicated region body
PF: predicated region fallthrough
CT: control target
= control target key end

     0   :  { %v1148_v44 = vmov 0.0   ;;  %vm1149_vm0 = vmmov 0   ;;  %vm449_vm1 = vcmask 261120   ;;  %s1451_s0 = inlined_call_operand.vmem [shape: f32[8,800], index: 0, kind: input, shape index: {}]   ;;  %s1452_s1 = inlined_call_operand.vmem [shape: bf16[800,100], index: 1, kind: input, shape index: {}]   ;;  %s1453_s2 = inlined_call_operand.vmem [shape: f32[1,100], index: 2, kind: input, shape index: {}]   ;;  %s1454_s3 = inlined_call_operand.vmem [shape: bf16[100,100], index: 3, kind: input, shape index: {}]   ;;  %s1455_s4 = inlined_call_operand.vmem [shape: f32[1,100], index: 4, kind: input, shape index: {}]   ;;  %s1456_s5 = inlined_call_operand.vmem [shape: bf16[100,128], index: 5, kind: input, shape index: {}]   ;;  %s1457_s6 = inlined_call_operand.vmem [shape: f32[1,128], index: 6, kind: input, shape index: {}]   ;;  %s1458_s7 = inlined_call_operand.hbm [shape: f32[8,128], index: 7, kind: output, shape index: {}]  }
   0x1   :  { %v1056_v0 = vld [vmem:[%s1452_s1 + $0x40] sm:$0xff]   ;;  %v1060_v4 = vld [vmem:[%s1452_s1 + $0x48] sm:$0xff]   ;;  %v1064_v8 = vld [vmem:[%s1452_s1 + $0x50] sm:$0xff]  }
   0x2   :  { %v1057_v1 = vld [vmem:[%s1452_s1] sm:$0xff]   ;;  %924 = vmatprep.subr.bf16.mxu0 %v1056_v0  ;;  %v1061_v5 = vld [vmem:[%s1452_s1 + $0x8] sm:$0xff]   ;;  %v1065_v9 = vld [vmem:[%s1452_s1 + $0x10] sm:$0xff]  }
   0x3   :  { %v1058_v2 = vld [vmem:[%s1452_s1 + $0xc0] sm:$0xff]   ;;  %925 = vmatpush3.bf16.msra.mxu0 %v1057_v1  ;;  %v1062_v6 = vld [vmem:[%s1452_s1 + $0xc8] sm:$0xff]   ;;  %v1066_v10 = vld [vmem:[%s1452_s1 + $0xd0] sm:$0xff]  }
   0x4   :  { %v1059_v3 = vld [vmem:[%s1452_s1 + $0x80] sm:$0xff]   ;;  %946 = vmatprep.subr.bf16.mxu1 %v1058_v2  ;;  %926 = vmatprep.subr.bf16.mxu0 %v1060_v4  ;;  %v1063_v7 = vld [vmem:[%s1452_s1 + $0x88] sm:$0xff]   ;;  %v1067_v11 = vld [vmem:[%s1452_s1 + $0x90] sm:$0xff]  }
   0x5   :  { %947 = vmatpush3.bf16.msra.mxu1 %v1059_v3  ;;  %v1068_v12 = vld [vmem:[%s1452_s1 + $0x58] sm:$0xff]   ;;  %v1072_v16 = vld [vmem:[%s1452_s1 + $0x60] sm:$0xff]   ;;  %v1076_v20 = vld [vmem:[%s1452_s1 + $0x68] sm:$0xff]  }
   0x6   :  { %948 = vmatprep.subr.bf16.mxu1 %v1062_v6  ;;  %v1069_v13 = vld [vmem:[%s1452_s1 + $0x18] sm:$0xff]   ;;  %v1073_v17 = vld [vmem:[%s1452_s1 + $0x20] sm:$0xff]   ;;  %v1077_v21 = vld [vmem:[%s1452_s1 + $0x28] sm:$0xff]  }
   0x7   :  { %927 = vmatpush3.bf16.msra.mxu0 %v1061_v5  ;;  %v1070_v14 = vld [vmem:[%s1452_s1 + $0xd8] sm:$0xff]   ;;  %v1074_v18 = vld [vmem:[%s1452_s1 + $0xe0] sm:$0xff]   ;;  %v1078_v22 = vld [vmem:[%s1452_s1 + $0xe8] sm:$0xff]  }
   0x8   :  { %928 = vmatprep.subr.bf16.mxu0 %v1064_v8  ;;  %v1071_v15 = vld [vmem:[%s1452_s1 + $0x98] sm:$0xff]   ;;  %v1075_v19 = vld [vmem:[%s1452_s1 + $0xa0] sm:$0xff]   ;;  %v1079_v23 = vld [vmem:[%s1452_s1 + $0xa8] sm:$0xff]  }
   0x9   :  { %949 = vmatpush3.bf16.msra.mxu1 %v1063_v7  ;;  %v1080_v24 = vld [vmem:[%s1452_s1 + $0x70] sm:$0xff]   ;;  %v1084_v28 = vld [vmem:[%s1452_s1 + $0x78] sm:$0xff]   ;;  %v29_v31 = vld [vmem:[%s1451_s0 + $0x8] sm:$0xff] }
   0xa   :  { %950 = vmatprep.subr.bf16.mxu1 %v1066_v10  ;;  %v1081_v25 = vld [vmem:[%s1452_s1 + $0x30] sm:$0xff]   ;;  %v1085_v29 = vld [vmem:[%s1452_s1 + $0x38] sm:$0xff]   ;;  %v36_v32 = vpack.c.bf16 %v29_v31, %v29_v31  ;;  %v28_v34 = vld [vmem:[%s1451_s0] sm:$0xff] }
   0xb   :  { %929 = vmatpush3.bf16.msra.mxu0 %v1065_v9  ;;  %v1082_v26 = vld [vmem:[%s1452_s1 + $0xf0] sm:$0xff]   ;;  %v1086_v30 = vld [vmem:[%s1452_s1 + $0xf8] sm:$0xff]   ;;  %v35_v35 = vpack.c.bf16 %v28_v34, %v28_v34  ;;  %v1088_v36 = vld [vmem:[%s1452_s1 + $0x140] sm:$0xff]  }
   0xc   :  { %930 = vmatprep.subr.bf16.mxu0 %v1068_v12  ;;  %v1083_v27 = vld [vmem:[%s1452_s1 + $0xb0] sm:$0xff]   ;;  %v1087_v33 = vld [vmem:[%s1452_s1 + $0xb8] sm:$0xff]   ;;  %485 = vmatprep.mubr.bf16.mxu0 %v36_v32  ;;  %v1089_v39 = vld [vmem:[%s1452_s1 + $0x100] sm:$0xff]  }
   0xd   :  { %951 = vmatpush3.bf16.msra.mxu1 %v1067_v11  ;;  %v31_v37 = vld [vmem:[%s1451_s0 + $0x18] sm:$0xff]  ;;  %v30_v40 = vld [vmem:[%s1451_s0 + $0x10] sm:$0xff]  ;;  %v1090_v42 = vld [vmem:[%s1452_s1 + $0x148] sm:$0xff]  }
   0xe   :  { %952 = vmatprep.subr.bf16.mxu1 %v1070_v14  ;;  %v38_v38 = vpack.c.bf16 %v31_v37, %v31_v37  ;;  %v37_v41 = vpack.c.bf16 %v30_v40, %v30_v40  ;;  %v1091_v43 = vld [vmem:[%s1452_s1 + $0x108] sm:$0xff]   ;;  %v1092_v45 = vld [vmem:[%s1452_s1 + $0x150] sm:$0xff]   ;;  %v1094_v47 = vld [vmem:[%s1452_s1 + $0x158] sm:$0xff]  }
   0xf   :  { %931 = vmatpush3.bf16.msra.mxu0 %v1069_v13  ;;  %v1093_v46 = vld [vmem:[%s1452_s1 + $0x110] sm:$0xff]   ;;  %v1095_v48 = vld [vmem:[%s1452_s1 + $0x118] sm:$0xff]   ;;  %v1096_v49 = vld [vmem:[%s1452_s1 + $0x160] sm:$0xff]  }
  0x10   :  { %932 = vmatprep.subr.bf16.mxu0 %v1072_v16  ;;  %525 = vmatprep.mubr.bf16.mxu1 %v38_v38  ;;  %v1097_v50 = vld [vmem:[%s1452_s1 + $0x120] sm:$0xff]   ;;  %v1098_v52 = vld [vmem:[%s1452_s1 + $0x168] sm:$0xff]   ;;  %v1100_v55 = vld [vmem:[%s1452_s1 + $0x170] sm:$0xff]  }
  0x11   :  { %953 = vmatpush3.bf16.msra.mxu1 %v1071_v15  ;;  %v1102_v51 = vld [vmem:[%s1452_s1 + $0x180] sm:$0xff]   ;;  %v1099_v53 = vld [vmem:[%s1452_s1 + $0x128] sm:$0xff]   ;;  %v34_v58 = vld [vmem:[%s1451_s0 + $0x30] sm:$0xff] }
  0x12   :  { %954 = vmatprep.subr.bf16.mxu1 %v1074_v18  ;;  %v33_v54 = vld [vmem:[%s1451_s0 + $0x28] sm:$0xff]  ;;  %v41_v59 = vpack.c.bf16 %v34_v58, %v34_v58  ;;  %v1101_v60 = vld [vmem:[%s1452_s1 + $0x130] sm:$0xff]   ;;  %v1103_v61 = vld [vmem:[%s1452_s1 + $0x178] sm:$0xff]  }
  0x13   :  { %933 = vmatpush3.bf16.msra.mxu0 %v1073_v17  ;;  %v40_v56 = vpack.c.bf16 %v33_v54, %v33_v54  ;;  %v1105_v57 = vld [vmem:[%s1452_s1 + $0x188] sm:$0xff]   ;;  %v1104_v62 = vld [vmem:[%s1452_s1 + $0x138] sm:$0xff]   ;;  %v32_v63 = vld [vmem:[%s1451_s0 + $0x20] sm:$0xff] }
  0x14   :  { %934 = vmatprep.subr.bf16.mxu0 %v1076_v20 }
  0x15   :  { %955 = vmatpush3.bf16.msra.mxu1 %v1075_v19 }
  0x16   :  { %956 = vmatprep.subr.bf16.mxu1 %v1078_v22 }
  0x17   :  { %935 = vmatpush3.bf16.msra.mxu0 %v1077_v21 }
  0x18   :  { %936 = vmatprep.subr.bf16.mxu0 %v1080_v24 }
  0x19   :  { %957 = vmatpush3.bf16.msra.mxu1 %v1079_v23 }
  0x1a   :  { %958 = vmatprep.subr.bf16.mxu1 %v1082_v26 }
  0x1b   :  { %937 = vmatpush3.bf16.msra.mxu0 %v1081_v25 }
  0x1c   :  { %938 = vmatprep.subr.bf16.mxu0 %v1084_v28 }
  0x1d   :  { %959 = vmatpush3.bf16.msra.mxu1 %v1083_v27 }
  0x1e   :  { %960 = vmatprep.subr.bf16.mxu1 %v1086_v30 }
  0x1f   :  { %939 = vmatpush3.bf16.msra.mxu0 %v1085_v29 }
  0x20   :  { %968 = vmatprep.subr.bf16.mxu0 %v1088_v36 }
  0x21   :  { %961 = vmatpush3.bf16.msra.mxu1 %v1087_v33 }
  0x22   :  { %486 = vmatmul.mubr.bf16.vlgmr.msra.gmra.mrb[0].mxu0 %v35_v35  ;;  %1009 = vmatprep.subr.bf16.mxu1 %v1148_v44 }
  0x23   :  { %969 = vmatpush3.bf16.msra.mxu0 %v1089_v39  ;;  %565 = vmatprep.mubr.bf16.mxu0 %v40_v56 }
  0x24   :  { %526 = vmatmul.mubr.bf16.vlgmr.msra.gmra.mrb[0].mxu1 %v37_v41  ;;  %970 = vmatprep.subr.bf16.mxu0 %v1090_v42 }
  0x25   :  { %1013 = vmatprep.mubr.msk.bf16.mxu1 %vm1149_vm0, %v1148_v44  ;;  %1010 = vmatpush3.bf16.msra.mxu1 %v1102_v51 }
  0x26   :  { %1011 = vmatprep.subr.bf16.mxu1 %v1148_v44 }
  0x27   :  { %971 = vmatpush3.bf16.msra.mxu0 %v1091_v43 }
  0x28   :  { %972 = vmatprep.subr.bf16.mxu0 %v1092_v45 }
  0x29   :  { %1012 = vmatpush3.bf16.msra.mxu1 %v1105_v57 }
  0x2a   :  { %1017 = vmatprep.subr.bf16.mxu1 %v1148_v44 }
  0x2b   :  { %973 = vmatpush3.bf16.msra.mxu0 %v1093_v46 }
  0x2c   :  { %974 = vmatprep.subr.bf16.mxu0 %v1094_v47  ;;  %1014 = vmatmul.mubr.msk.bf16.vlgmr.msra.gmra.mrb[4].mxu1 %vm449_vm1, %v41_v59 }
  0x2d   :  { %1031 = vmatprep.mubr.msk.bf16.mxu1 %vm1149_vm0, %v1148_v44 }
  0x2f   :  { %975 = vmatpush3.bf16.msra.mxu0 %v1095_v48 }
  0x30   :  { %976 = vmatprep.subr.bf16.mxu0 %v1096_v49 }
  0x33   :  { %977 = vmatpush3.bf16.msra.mxu0 %v1097_v50 }
  0x34   :  { %978 = vmatprep.subr.bf16.mxu0 %v1098_v52 }
  0x37   :  { %979 = vmatpush3.bf16.msra.mxu0 %v1099_v53 }
  0x38   :  { %980 = vmatprep.subr.bf16.mxu0 %v1100_v55 }
  0x3b   :  { %981 = vmatpush3.bf16.msra.mxu0 %v1101_v60 }
  0x3c   :  { %982 = vmatprep.subr.bf16.mxu0 %v1103_v61 }
  0x3d   :  { %12 = vsyncpa [#allocation3], 0  ;;  %v39_v0 = vpack.c.bf16 %v32_v63, %v32_v63  ;;  %v1106_v1 = vld [vmem:[%s1454_s3] sm:$0xff]   ;;  %v1107_v2 = vld [vmem:[%s1454_s3 + $0x8] sm:$0xff]   ;;  %vm678_vm2 = vcmask 1041408   ;;  %vm674_vm3 = vcmask 818176  }
  0x3e   :  { %1018 = vmatpush3.bf16.msra.mxu1 %v1106_v1  ;;  %v1108_v3 = vld [vmem:[%s1454_s3 + $0x10] sm:$0xff]   ;;  %v1109_v4 = vld [vmem:[%s1454_s3 + $0x18] sm:$0xff]   ;;  %v1110_v5 = vld [vmem:[%s1454_s3 + $0x20] sm:$0xff]  }
  0x3f   :  { %983 = vmatpush3.bf16.msra.mxu0 %v1104_v62  ;;  %1019 = vmatprep.subr.bf16.mxu1 %v1148_v44  ;;  %v1111_v6 = vld [vmem:[%s1454_s3 + $0x28] sm:$0xff]   ;;  %v1112_v7 = vld [vmem:[%s1454_s3 + $0x30] ss:$0 sps:$4 sm:$0x33]   ;;  %v1113_v9 = vld [vmem:[%s1456_s5] sm:$0xff]  }
  0x40   :  { %1035 = vmatprep.subr.bf16.mxu0 %v1148_v44  ;;  %v680_v8 = vsel %vm678_vm2, %v1112_v7, 0  ;;  %v1114_v10 = vld [vmem:[%s1456_s5 + $0x8] sm:$0xff]   ;;  %v1115_v11 = vld [vmem:[%s1456_s5 + $0x10] sm:$0xff]   ;;  %v1116_v12 = vld [vmem:[%s1456_s5 + $0x18] sm:$0xff]  }
  0x41   :  { %v1117_v13 = vld [vmem:[%s1456_s5 + $0x20] sm:$0xff]   ;;  %v1118_v40 = vld [vmem:[%s1456_s5 + $0x28] sm:$0xff]   ;;  %v1119_v41 = vld [vmem:[%s1456_s5 + $0x30] ss:$0 sps:$4 sm:$0x33]  }
  0x42   :  { %566 = vmatmul.mubr.bf16.vlgmr.msra.gmra.mrb[4].mxu0 %v39_v0  ;;  %1020 = vmatpush3.bf16.msra.mxu1 %v1107_v2  ;;  %v854_v15 = vld [vmem:[%s1453_s2] ss:$0 sm:$0xff]  ;;  %v787_v42 = vsel %vm678_vm2, %v1119_v41, 0 }
  0x43   :  { %1049 = vmatprep.mubr.msk.bf16.mxu0 %vm1149_vm0, %v1148_v44  ;;  %1021 = vmatprep.subr.bf16.mxu1 %v1148_v44  ;;  %v906_v43 = vld [vmem:[%s1455_s4] ss:$0 sm:$0xff]  ;;  %s1150_s4 = smov [#allocation2]  }
  0x44   :  { %1036 = vmatpush3.bf16.msra.mxu0 %v1113_v9  ;;  %s846_s5 = sshll.u32 %s1150_s4, 4  ;;  %s847_s5 = int_to_ptr.vmem [resolvable:$true] %s846_s5 }
  0x45   :  { %1037 = vmatprep.subr.bf16.mxu0 %v1148_v44  ;;  %p1129_p1 = scmp.lt.s32.totalorder %s847_s5, %s847_s5 }
  0x46   :  { %1022 = vmatpush3.bf16.msra.mxu1 %v1108_v3 }
  0x47   :  { %1023 = vmatprep.subr.bf16.mxu1 %v1148_v44 }
  0x48   :  { %1038 = vmatpush3.bf16.msra.mxu0 %v1114_v10 }
  0x49   :  { %1039 = vmatprep.subr.bf16.mxu0 %v1148_v44 }
  0x4a   :  { %1024 = vmatpush3.bf16.msra.mxu1 %v1109_v4 }
  0x4b   :  { %1025 = vmatprep.subr.bf16.mxu1 %v1148_v44 }
  0x4c   :  { %1040 = vmatpush3.bf16.msra.mxu0 %v1115_v11 }
  0x4d   :  { %1041 = vmatprep.subr.bf16.mxu0 %v1148_v44 }
  0x4e   :  { %1026 = vmatpush3.bf16.msra.mxu1 %v1110_v5 }
  0x4f   :  { %1027 = vmatprep.subr.bf16.mxu1 %v1148_v44 }
  0x50   :  { %1042 = vmatpush3.bf16.msra.mxu0 %v1116_v12 }
  0x51   :  { %1043 = vmatprep.subr.bf16.mxu0 %v1148_v44 }
  0x52   :  { %1028 = vmatpush3.bf16.msra.mxu1 %v1111_v6 }
  0x53   :  { %1029 = vmatprep.subr.bf16.mxu1 %v1148_v44 }
  0x54   :  { %1044 = vmatpush3.bf16.msra.mxu0 %v1117_v13 }
  0x55   :  { %1045 = vmatprep.subr.bf16.mxu0 %v1148_v44 }
  0x56   :  { %1030 = vmatpush3.bf16.msra.mxu1 %v680_v8 }
  0x58   :  { %1046 = vmatpush3.bf16.msra.mxu0 %v1118_v40 }
  0x59   :  { %1047 = vmatprep.subr.bf16.mxu0 %v1148_v44  ;;  %v915_v44 = vld [vmem:[%s1457_s6] ss:$0 sm:$0xff]  ;;  %s1124_s6 = scalar_lea.vmem %s847_s5, 128 }
  0x5a   :  { %p1125_p0 = scmp.ne.s32.totalorder %s847_s5, %s1124_s6  ;;  %p1130_p2 = scmp.lt.s32.totalorder %s1124_s6, %s1124_s6 }
  0x5c   :  { %1048 = vmatpush3.bf16.msra.mxu0 %v787_v42  ;;  %p1131_p3 = por %p1130_p2, %p1129_p1 }
  0x5e   :  { %p1132_p4 = pnand %p1131_p3, %p1125_p0 }
  0xf5   :  { %v940_v14 = vpop.f32.mrb[0].mxu0 }
  0xf6   :  { %v941_v16 = vpop.f32.mrb[1].mxu0 }
  0xf7   :  { %v942_v17 = vadd.f32 %v941_v16, %v940_v14  ;;  %v943_v18 = vpop.f32.mrb[2].mxu0  ;;  %v962_v19 = vpop.f32.mrb[0].mxu1 }
  0xf8   :  { %v944_v20 = vpop.f32.mrb[3].mxu0  ;;  %v963_v22 = vpop.f32.mrb[1].mxu1 }
  0xf9   :  { %v488_v21 = vadd.f32 %v942_v17, %v854_v15  ;;  %v964_v23 = vadd.f32 %v963_v22, %v962_v19  ;;  %v965_v24 = vpop.f32.mrb[2].mxu1 }
  0xfa   :  { %v966_v25 = vpop.f32.mrb[3].mxu1 }
  0xfb   :  { %v528_v26 = vadd.f32 %v964_v23, %v488_v21 }
  0xff   :  { %v607_v27 = vpop.f32.mrb[4].mxu1 }
 0x100   :  { %v1015_v28 = vpop.f32.mrb[5].mxu1 }
 0x101   :  { %v610_v29 = vpop.f32.mrb[6].mxu1 }
 0x102   :  { %v1016_v30 = vpop.f32.mrb[7].mxu1 }
 0x115   :  { %v984_v31 = vpop.f32.mrb[4].mxu0 }
 0x116   :  { %v985_v32 = vpop.f32.mrb[5].mxu0 }
 0x117   :  { %v986_v33 = vadd.f32 %v985_v32, %v984_v31  ;;  %v987_v34 = vpop.f32.mrb[6].mxu0 }
 0x118   :  { %v988_v35 = vpop.f32.mrb[7].mxu0 }
 0x119   :  { %v568_v36 = vadd.f32 %v986_v33, %v528_v26 }
 0x11b   :  { %v608_v37 = vadd.f32 %v607_v27, %v568_v36 }
 0x11d   :  { %v613_v38 = vmax.f32 %v608_v37, 0.0 }
 0x11f   :  { %v614_v39 = vpack.c.bf16 %v613_v38, %v613_v38 }
 0x121   :  { %1032 = vmatmul.mubr.msk.bf16.vlgmr.msra.gmra.mrb[8].mxu1 %vm674_vm3, %v614_v39 }
 0x1f4   :  { %v716_v45 = vpop.f32.mrb[8].mxu1 }
 0x1f5   :  { %v717_v46 = vadd.f32 %v906_v43, %v716_v45  ;;  %v1033_v47 = vpop.f32.mrb[9].mxu1 }
 0x1f6   :  { %v719_v48 = vpop.f32.mrb[10].mxu1 }
 0x1f7   :  { %v722_v49 = vmax.f32 %v717_v46, 0.0  ;;  %v1034_v50 = vpop.f32.mrb[11].mxu1 }
 0x1f9   :  { %v723_v51 = vpack.c.bf16 %v722_v49, %v722_v49 }
 0x1fb   :  { %1050 = vmatmul.mubr.msk.bf16.vlgmr.msra.gmra.mrb[8].mxu0 %vm674_vm3, %v723_v51 }
 0x2ce   :  { %v823_v52 = vpop.f32.mrb[8].mxu0 }
 0x2cf   :  { %v824_v53 = vadd.f32 %v915_v44, %v823_v52  ;;  %v1051_v54 = vpop.f32.mrb[9].mxu0 }
 0x2d0   :  { %v826_v55 = vpop.f32.mrb[10].mxu0 }
 0x2d1   :  { %829 = vmax.xlane.f32.xlu0 %v824_v53  ;;  %v1052_v56 = vpop.f32.mrb[11].mxu0 }
 0x35e   :  { %v830_v57 = vpop.xlane.xlu0 %829 }
 0x35f   :  { %v831_v58 = vsub.f32 %v824_v53, %v830_v57 }
 0x361   :  { %v832_v59 = vmul.f32 1.442695, %v831_v58 }
 0x363   :  { %1120 = vpow2.f32 %v832_v59 }
 0x36d   :  { %v1121_v60 = vpop.eup %1120 }
 0x36e   :  { %834 = vadd.xlane.f32.xlu0 %v1121_v60 }
 0x3fb   :  { %v835_v61 = vpop.xlane.xlu0 %834 }
 0x3fc   :  { %1122 = vlog2.f32 %v835_v61 }
 0x406   :  { %v1123_v62 = vpop.eup %1122 }
 0x407   :  { %v837_v63 = vmul.f32 0.6931472, %v1123_v62 }
 0x409   :  { %v838_v0 = vsub.f32 %v831_v58, %v837_v63 }
 0x40b   :  { %839 = vst [vmem:[#allocation2] sm:$0xff] %v838_v0 }
 0x40c   :  { %1135 = shalt.err (!%p1132_p4)
}
 0x40d   :  { %s1136_s30 = scalar_lea.hbm %s1458_s7, 128 }
 0x40e   :  { %p1137_p5 = scmp.ne.s32.totalorder %s1458_s7, %s1136_s30  ;;  %p1140_p6 = scmp.lt.u32.totalorder %s1136_s30, %s1458_s7 }
 0x410   :  { %p1142_p7 = pnand %p1140_p6, %p1137_p5 }
 0x412   :  { %1145 = shalt.err (!%p1142_p7)
}
 0x413   :  { %849 = dma.vmem_to_hbm [thread:$0]  %s847_s5, 128, %s1458_s7, [#allocation3]  }
 0x414   :  { %1146 = dma.done.wait [#allocation3], 128  }
 0x415   :  { %1147 = vsyncadd [#allocation3], 4294967168 }
 0x416   :  { %853 = vsyncpa [#allocation3], 1 }

</bundles_post_ra>
